<compile_context>
chip_gen: v7x
topology: tpu7x:2x2x1
jax: 0.10.0
libtpu: 0.0.40
codegen_flags: <defaults>
</compile_context>

<pallas_src>
import jax
import jax.numpy as jnp
from jax.experimental import pallas as pl
from jax.experimental.pallas import tpu as pltpu


def conv1x1_tanh_kernel(x_ref, w_ref, b_ref, o_ref):
    # x_ref: (Cin, tm)   channels on sublanes, pixels on lanes (batch dim squeezed)
    # w_ref: (Cout, Cin) full weight
    # b_ref: (Cout, 1)   full bias
    # o_ref: (Cout, tm)  lane-dense output tile
    x = x_ref[...].astype(jnp.float32)      # (Cin, tm)
    w = w_ref[...].astype(jnp.float32)      # (Cout, Cin)
    b = b_ref[...].astype(jnp.float32)      # (Cout, 1)
    cout, cin = w.shape

    if cout < 128 and cin <= 32:
        # Small-Cout / tiny-K: broadcast-FMA on the VPU (statically unrolled so the
        # LLO scheduler sees it); an MXU push/pop here would run <10% utilized.
        acc = b + w[:, 0:1] * x[0:1, :]
        for k in range(1, cin):
            acc = acc + w[:, k:k + 1] * x[k:k + 1, :]
    else:
        acc = jnp.dot(w, x, preferred_element_type=jnp.float32) + b

    # jnp.tanh rides the EUP slot (separate VLIW slot from the VALU FMAs above).
    o_ref[...] = jnp.tanh(acc).astype(o_ref.dtype)


def _round_up(x, m):
    return ((x + m - 1) // m) * m


def conv1x1_tanh(x_nchw, weight, bias, *, tm=32768, min_pixel_blocks=2,
                 out_dtype=None):
    """1x1 conv + tanh, fused Pallas kernel.

    x_nchw: (N, Cin, H, W)    float32
    weight: (Cout, Cin, 1, 1) (PyTorch Conv2d weight layout)
    bias:   (Cout,)
    returns (N, Cout, H, W)

    out_dtype: keep None (= input dtype, f32) for exact PyTorch semantics; pass
    jnp.bfloat16 to roughly halve HBM writeback if the consumer tolerates it.
    """
    N, Cin, H, W = x_nchw.shape
    Cout = weight.shape[0]
    M_pix = H * W
    out_dtype = x_nchw.dtype if out_dtype is None else out_dtype

    # Pure reshapes: NCHW already has channels leading per batch image.
    x_r = x_nchw.reshape(N, Cin, M_pix)     # (N, Cin, HW)
    w_mat = weight.reshape(Cout, Cin)       # (Cout, Cin)
    b_mat = bias.reshape(Cout, 1)           # (Cout, 1)

    # Pixel tile: lane-dense (multiple of 128), split into >= min_pixel_blocks
    # blocks so v7x's two TensorCores both get work, capped at `tm` so each
    # double-buffered tile stays comfortably inside scoped VMEM.
    if M_pix % 128 == 0:
        target = max(128, _round_up(pl.cdiv(M_pix, min_pixel_blocks), 128))
        tile_m = min(tm, target)
    else:
        tile_m = M_pix  # full-extent block satisfies the lane constraint
    grid = (N, pl.cdiv(M_pix, tile_m))

    out = pl.pallas_call(
        conv1x1_tanh_kernel,
        out_shape=jax.ShapeDtypeStruct((N, Cout, M_pix), out_dtype),
        grid_spec=pltpu.PrefetchScalarGridSpec(
            num_scalar_prefetch=0,
            grid=grid,
            in_specs=[
                # Squeeze the size-1 batch block dim -> kernel sees (Cin, tile_m).
                pl.BlockSpec((pl.Squeezed(), Cin, tile_m), lambda n, i: (n, 0, i)),
                pl.BlockSpec((Cout, Cin), lambda n, i: (0, 0)),   # full weight
                pl.BlockSpec((Cout, 1), lambda n, i: (0, 0)),     # full bias
            ],
            out_specs=pl.BlockSpec((pl.Squeezed(), Cout, tile_m),
                                   lambda n, i: (n, 0, i)),
        ),
        compiler_params=pltpu.CompilerParams(
            dimension_semantics=("parallel", "parallel"),
        ),
    )(x_r, w_mat, b_mat)

    return out.reshape(N, Cout, H, W)


if __name__ == "__main__":
    key = jax.random.PRNGKey(0)
    k_x, k_w, k_b = jax.random.split(key, 3)

    # Shapes implied by the module: Conv2d(3, 24, 1) on x = randn(1, 3, 64, 64).
    N, Cin, H, W = 1, 3, 64, 64
    Cout = 24

    x = jax.random.normal(k_x, (N, Cin, H, W), dtype=jnp.float32)
    weight = jax.random.normal(k_w, (Cout, Cin, 1, 1), dtype=jnp.float32) * 0.1
    bias = jax.random.normal(k_b, (Cout,), dtype=jnp.float32) * 0.1

    out = conv1x1_tanh(x, weight, bias)
    out = jax.block_until_ready(out)

    # Reference (plain JAX) to sanity-check semantics.
    ref = jnp.tanh(
        jnp.einsum("nchw,oc->nohw", x, weight.reshape(Cout, Cin))
        + bias[None, :, None, None]
    )
    assert out.shape == (N, Cout, H, W)
    assert jnp.allclose(out, ref, atol=1e-5, rtol=1e-5)

    print("KERNEL_OK")
</pallas_src>

<mosaic_0001>
module attributes {stable_mosaic.version = 11 : i64} {
  func.func @conv1x1_tanh_kernel(%arg0: i32, %arg1: i32, %arg2: memref<1x3x2048xf32, #tpu.memory_space<vmem>>, %arg3: memref<24x3xf32, #tpu.memory_space<vmem>>, %arg4: memref<24x1xf32, #tpu.memory_space<vmem>>, %arg5: memref<1x24x2048xf32, #tpu.memory_space<vmem>>) attributes {dimension_semantics = [#tpu.dimension_semantics<parallel>, #tpu.dimension_semantics<parallel>], iteration_bounds = array<i64: 1, 2>, scalar_prefetch = 0 : i64, scratch_operands = 0 : i64, tpu.core_type = #tpu.core_type<tc>, window_params = [{transform_indices = @transform_0, window_bounds = array<i64: 1, 3, 2048>}, {pipeline_mode = #tpu.pipeline_mode<synchronous>, transform_indices = @transform_1, window_bounds = array<i64: 24, 3>}, {pipeline_mode = #tpu.pipeline_mode<synchronous>, transform_indices = @transform_2, window_bounds = array<i64: 24, 1>}, {transform_indices = @transform_3, window_bounds = array<i64: 1, 24, 2048>}]} {
    %c0 = arith.constant 0 : index
    %c0_0 = arith.constant 0 : index
    %c0_1 = arith.constant 0 : index
    %0 = vector.load %arg2[%c0, %c0_0, %c0_1] : memref<1x3x2048xf32, #tpu.memory_space<vmem>>, vector<1x3x2048xf32>
    %1 = vector.shape_cast %0 : vector<1x3x2048xf32> to vector<3x2048xf32>
    %c0_2 = arith.constant 0 : index
    %c0_3 = arith.constant 0 : index
    %2 = vector.load %arg3[%c0_2, %c0_3] : memref<24x3xf32, #tpu.memory_space<vmem>>, vector<24x3xf32>
    %c0_4 = arith.constant 0 : index
    %c0_5 = arith.constant 0 : index
    %3 = vector.load %arg4[%c0_4, %c0_5] : memref<24x1xf32, #tpu.memory_space<vmem>>, vector<24x1xf32>
    %4 = vector.extract_strided_slice %2 {offsets = [0, 0], sizes = [24, 1], strides = [1, 1]} : vector<24x3xf32> to vector<24x1xf32>
    %5 = vector.extract_strided_slice %1 {offsets = [0, 0], sizes = [1, 2048], strides = [1, 1]} : vector<3x2048xf32> to vector<1x2048xf32>
    %6 = vector.broadcast %4 : vector<24x1xf32> to vector<24x2048xf32>
    %7 = vector.broadcast %5 : vector<1x2048xf32> to vector<24x2048xf32>
    %8 = arith.mulf %6, %7 : vector<24x2048xf32>
    %9 = vector.broadcast %3 : vector<24x1xf32> to vector<24x2048xf32>
    %10 = arith.addf %9, %8 : vector<24x2048xf32>
    %11 = vector.extract_strided_slice %2 {offsets = [0, 1], sizes = [24, 1], strides = [1, 1]} : vector<24x3xf32> to vector<24x1xf32>
    %12 = vector.extract_strided_slice %1 {offsets = [1, 0], sizes = [1, 2048], strides = [1, 1]} : vector<3x2048xf32> to vector<1x2048xf32>
    %13 = vector.broadcast %11 : vector<24x1xf32> to vector<24x2048xf32>
    %14 = vector.broadcast %12 : vector<1x2048xf32> to vector<24x2048xf32>
    %15 = arith.mulf %13, %14 : vector<24x2048xf32>
    %16 = arith.addf %10, %15 : vector<24x2048xf32>
    %17 = vector.extract_strided_slice %2 {offsets = [0, 2], sizes = [24, 1], strides = [1, 1]} : vector<24x3xf32> to vector<24x1xf32>
    %18 = vector.extract_strided_slice %1 {offsets = [2, 0], sizes = [1, 2048], strides = [1, 1]} : vector<3x2048xf32> to vector<1x2048xf32>
    %19 = vector.broadcast %17 : vector<24x1xf32> to vector<24x2048xf32>
    %20 = vector.broadcast %18 : vector<1x2048xf32> to vector<24x2048xf32>
    %21 = arith.mulf %19, %20 : vector<24x2048xf32>
    %22 = arith.addf %16, %21 : vector<24x2048xf32>
    %23 = math.tanh %22 : vector<24x2048xf32>
    %c0_6 = arith.constant 0 : index
    %c0_7 = arith.constant 0 : index
    %c0_8 = arith.constant 0 : index
    %24 = vector.load %arg5[%c0_6, %c0_7, %c0_8] : memref<1x24x2048xf32, #tpu.memory_space<vmem>>, vector<1x24x2048xf32>
    %25 = vector.shape_cast %24 : vector<1x24x2048xf32> to vector<24x2048xf32>
    %26 = vector.shape_cast %23 : vector<24x2048xf32> to vector<1x24x2048xf32>
    tpu.vector_store %arg5[%c0_6, %c0_7, %c0_8], %26 {strides = array<i32>} : memref<1x24x2048xf32, #tpu.memory_space<vmem>>, vector<1x24x2048xf32>,
    return
  }
  func.func @transform_0(%arg0: i32, %arg1: i32) -> (i32, i32, i32) {
    %c0_i32 = arith.constant 0 : i32
    %c0_i32_0 = arith.constant 0 : i32
    return %arg0, %c0_i32, %arg1 : i32, i32, i32
  }
  func.func @transform_1(%arg0: i32, %arg1: i32) -> (i32, i32) {
    %c0_i32 = arith.constant 0 : i32
    %c0_i32_0 = arith.constant 0 : i32
    %c0_i32_1 = arith.constant 0 : i32
    return %c0_i32, %c0_i32_0 : i32, i32
  }
  func.func @transform_2(%arg0: i32, %arg1: i32) -> (i32, i32) {
    %c0_i32 = arith.constant 0 : i32
    %c0_i32_0 = arith.constant 0 : i32
    %c0_i32_1 = arith.constant 0 : i32
    return %c0_i32, %c0_i32_0 : i32, i32
  }
  func.func @transform_3(%arg0: i32, %arg1: i32) -> (i32, i32, i32) {
    %c0_i32 = arith.constant 0 : i32
    %c0_i32_0 = arith.constant 0 : i32
    return %arg0, %c0_i32, %arg1 : i32, i32, i32
  }
}

</mosaic_0001>

<bundles_post_ra>
// kernel: tpu_custom_call.1
= control target key start
LH: loop header
LB: loop body
LE: loop exit
PB: predicated region body
PF: predicated region fallthrough
CT: control target
= control target key end

     0   :  { %8 = vsyncpa [#allocation3], 0  ;;  %s2245_s0 = inlined_call_operand.vmem [shape: f32[1,3,4096], index: 0, kind: input, shape index: {}]   ;;  %s2246_s1 = inlined_call_operand.vmem [shape: f32[24,3], index: 1, kind: input, shape index: {}]   ;;  %s2247_s2 = inlined_call_operand.vmem [shape: f32[24,1], index: 2, kind: input, shape index: {}]   ;;  %s2248_s3 = inlined_call_operand.hbm [shape: f32[1,24,4096], index: 3, kind: output, shape index: {}]  }
   0x1   :  { %10 = vsyncpa [#allocation3 + $0x1], 0  ;;  %s1470_s12 = smov 0   ;;  %s1472_s13 = smov 0  }
   0x2   :  { %s1474_s14 = smov 0   ;;  %s1476_s15 = smov 0  }
   0x3   :  { %s1478_s16 = smov 0   ;;  %s1480_s17 = smov 0  }
   0x4 LB: > { %s1187_s18 = sadd.s32 4294967295, %s1441_s17   ;;  %s1188_s19 = sadd.s32 4294967294, %s1441_s17   ;;  %s1441_s17 = sphi %s1480_s17, %s16_s17   ;;  %s1437_s16 = sphi %s1478_s16, %s2442_s16   ;;  %s1433_s15 = sphi %s1476_s15, %s2441_s15   ;;  %s1429_s14 = sphi %s1474_s14, %s2440_s14   ;;  %s1425_s13 = sphi %s1472_s13, %s2439_s13   ;;  %s1421_s12 = sphi %s1470_s12, %s2438_s12  }
   0x5   : > { %s25_s20 = sadd.s32 1, %s1437_s16  ;;  %s107_s21 = sadd.s32 1, %s1429_s14 }
   0x6   : > { %p26_p0 = scmp.ge.s32.totalorder %s25_s20, 2  ;;  %p117_p1 = scmp.ne.s32.totalorder %s1429_s14, %s1425_s13 }
   0x7   : > { %p118_p2 = scmp.eq.s32.totalorder %s1187_s18, 1  ;;  %p123_p3 = scmp.ne.s32.totalorder %s1425_s13, %s1421_s12 }
   0x8   : > { %s2444_s20 = smov (%p26_p0, %s25_s20), 0  ;;  %p124_p5 = scmp.eq.s32.totalorder %s1188_s19, 1 }
   0x9   : > { %p1510_p4 = por %p118_p2, %p117_p1  ;;  %s103_s23 = ssub.s32 %s1437_s16, %s2444_s20 }
   0xa   : > { %p1191_p6 = scmp.ge.s32.totalorder %s1441_s17, 1  ;;  %p105_p7 = scmp.eq.s32.totalorder %s103_s23, 0 }
   0xb   : > { %p1517_p8 = por %p124_p5, %p123_p3  ;;  %p161_p9 = scmp.lt.s32.totalorder %s1441_s17, 3 }
   0xc   : > { %s1523_s25 = scalar_select %p105_p7, %s1429_s14, %s107_s21  }
   0xd   : > { %p162_p10 = pnand %p1191_p6, %p161_p9 }
   0xf   : > { %165 = sbr.rel (%p162_p10) target bundleno = 269 (0x10d), region = 32 }
  0x16   : > { %v210_v0 = vld [vmem:[%s2246_s1 + $0x10] sm:$0xff]  ;;  %v208_v1 = vld [vmem:[%s2246_s1] sm:$0xff]  ;;  %v1443_v2 = vmov 0   ;;  %v209_v4 = vld [vmem:[%s2246_s1 + $0x8] sm:$0xff]  ;;  %v1444_v7 = vmov 1   ;;  %v1445_v8 = vmov 2   ;;  %v237_v9 = vlaneseq }
  0x17   : > { %1262 = vset.pattern.permute.xlu1 %v1443_v2  ;;  %1261 = vset.pattern.permute.xlu0 %v1443_v2  ;;  %v211_v3 = vld [vmem:[%s2247_s2] sm:$0xff]  ;;  %v213_v5 = vld [vmem:[%s2247_s2 + $0x10] sm:$0xff]  ;;  %v212_v6 = vld [vmem:[%s2247_s2 + $0x8] sm:$0xff]  ;;  %s1192_s11 = sshll.u32 %s1433_s15, 4  ;;  %s186_s26 = sand.u32 1, %s1425_s13  }
  0x18   : > { %226 = vperm.xlu1 %1262, %v210_v0   ;;  %216 = vperm.xlu0 %1261, %v208_v1   ;;  %p192_p11 = scmp.lt.s32.totalorder %s1192_s11, 31  ;;  %v238_v10 = vshrl.u32 %v237_v9, 7  ;;  %s1935_s27 = smul.u32 384, %s186_s26 }
  0x19   : > { %s1198_s29 = sshll.u32 %s1433_s15, 11  ;;  %s2199_s15 = scalar_lea.sflag [#allocation3], %s186_s26 }
  0x1a   : > { %s2446_s11 = smov (!%p192_p11, %s1192_s11), 31  ;;  %v239_v11 = vsub.s32 0, %v238_v10  ;;  %v243_v12 = vsub.s32 4, %v238_v10  ;;  %v506_v30 = vsub.s32 1, %v238_v10  ;;  %v510_v42 = vsub.s32 5, %v238_v10  ;;  %s1956_s28 = scalar_lea.vmem [#allocation2], %s1935_s27 }
  0x1b   : > { %s1193_s18 = sshll.u32 %s2446_s11, 2  ;;  %v1593_v46 = vsub.s32 2, %v238_v10  ;;  %v762_v2 = vsub.s32 6, %v238_v10  ;;  %s1108_s30 = sshll.u32 %s1956_s28, 4  ;;  %s2192_s30 = int_to_ptr.vmem [resolvable:$true] %s1108_s30 }
  0x1c   : > { %431 = vperm.xlu1 %1262, %v211_v3   ;;  %221 = vperm.xlu0 %1261, %v209_v4   ;;  %s197_s23 = scalar_lea.vmem %s2245_s0, %s1193_s18  ;;  %s2189_s6 = scalar_lea.hbm %s2248_s3, %s1198_s29 }
  0x1d   : > { %v1547_v13 = vld [vmem:[%s197_s23] sm:$0x77]  ;;  %v1549_v14 = vld [vmem:[%s197_s23 + $0x8] sm:$0x77]  ;;  %v1551_v15 = vld [vmem:[%s197_s23 + $0x10] sm:$0x77] }
  0x1e   : > { %v1553_v16 = vld [vmem:[%s197_s23 + $0x18] sm:$0x77]  ;;  %v1555_v17 = vld [vmem:[%s197_s23 + $0x20] sm:$0x77]  ;;  %v1557_v18 = vld [vmem:[%s197_s23 + $0x28] sm:$0x77]  ;;  %v240_v20 = vrot.slane %v1547_v13, %v239_v11  ;;  %v244_v21 = vrot.slane %v1547_v13, %v243_v12  ;;  %v248_v23 = vrot.slane %v1549_v14, %v239_v11  ;;  %v252_v24 = vrot.slane %v1549_v14, %v243_v12 }
  0x1f   : > { %v1559_v19 = vld [vmem:[%s197_s23 + $0x30] sm:$0x77]  ;;  %v1563_v22 = vld [vmem:[%s197_s23 + $0x38] sm:$0x77]  ;;  %v256_v25 = vrot.slane %v1551_v15, %v239_v11  ;;  %v260_v26 = vrot.slane %v1551_v15, %v243_v12  ;;  %v264_v27 = vrot.slane %v1553_v16, %v239_v11  ;;  %v268_v28 = vrot.slane %v1553_v16, %v243_v12  ;;  %s1363_s7 = scalar_lea.vmem %s2192_s30, 6144  ;;  %s1446_s8 = smov [#allocation2]  }
  0x20   : > { %441 = vperm.xlu1 %1262, %v213_v5   ;;  %436 = vperm.xlu0 %1261, %v212_v6   ;;  %v272_v29 = vrot.slane %v1555_v17, %v239_v11  ;;  %v276_v31 = vrot.slane %v1555_v17, %v243_v12  ;;  %v280_v32 = vrot.slane %v1557_v18, %v239_v11  ;;  %p1364_p12 = scmp.ne.s32.totalorder %s2192_s30, %s1363_s7  ;;  %s1367_s9 = sshll.u32 %s1446_s8, 4  ;;  %s1368_s9 = int_to_ptr.vmem [resolvable:$false] %s1367_s9 }
  0x21   : > { %v284_v33 = vrot.slane %v1557_v18, %v243_v12  ;;  %v288_v34 = vrot.slane %v1559_v19, %v239_v11  ;;  %v292_v35 = vrot.slane %v1559_v19, %v243_v12  ;;  %v296_v36 = vrot.slane %v1563_v22, %v239_v11  ;;  %s1369_s10 = scalar_lea.vmem %s1368_s9, 12288  ;;  %p1370_p1 = scmp.lt.s32.totalorder %s2192_s30, %s1368_s9 }
  0x22   : > { %v300_v37 = vrot.slane %v1563_v22, %v243_v12  ;;  %v1579_v38 = vrot.slane %v240_v20, %v239_v11  ;;  %v1581_v39 = vrot.slane %v244_v21, %v239_v11  ;;  %v1583_v40 = vrot.slane %v248_v23, %v239_v11  ;;  %p1365_p13 = pnand %p1364_p12, %p1510_p4  ;;  %p1371_p2 = scmp.lt.s32.totalorder %s1369_s10, %s1363_s7 }
  0x23   : > { %v1585_v41 = vrot.slane %v252_v24, %v239_v11  ;;  %v1587_v43 = vrot.slane %v256_v25, %v239_v11  ;;  %v1589_v44 = vrot.slane %v260_v26, %v239_v11  ;;  %v1591_v45 = vrot.slane %v264_v27, %v239_v11 }
  0x24   : > { %1264 = vset.pattern.permute.xlu1 %v1444_v7  ;;  %1263 = vset.pattern.permute.xlu0 %v1444_v7  ;;  %2302 = vst [vmem:[#allocation5_spill] sm:$0xff] %v1579_v38  ;;  %2303 = vst [vmem:[#allocation6_spill] sm:$0xff] %v1581_v39  ;;  %v1595_v47 = vrot.slane %v268_v28, %v239_v11  ;;  %v1597_v48 = vrot.slane %v272_v29, %v239_v11  ;;  %p1366_p0 = pneg %p1365_p13  ;;  %p1372_p3 = por %p1371_p2, %p1370_p1 }
  0x25   : > { %497 = vperm.xlu1 %1264, %v209_v4   ;;  %493 = vperm.xlu0 %1263, %v208_v1   ;;  %2304 = vst [vmem:[#allocation7_spill] sm:$0xff] %v1583_v40  ;;  %2305 = vst [vmem:[#allocation8_spill] sm:$0xff] %v1585_v41  ;;  %v1599_v49 = vrot.slane %v276_v31, %v239_v11  ;;  %v1601_v50 = vrot.slane %v280_v32, %v239_v11 }
  0x26   : > { %2306 = vst [vmem:[#allocation9_spill] sm:$0xff] %v1587_v43  ;;  %2307 = vst [vmem:[#allocation10_spill] sm:$0xff] %v1589_v44  ;;  %v1603_v51 = vrot.slane %v284_v33, %v239_v11  ;;  %v1605_v52 = vrot.slane %v288_v34, %v239_v11  ;;  %v1607_v53 = vrot.slane %v292_v35, %v239_v11  ;;  %p1373_p5 = pnand %p1372_p3, %p1366_p0 }
  0x27   : > { %2308 = vst [vmem:[#allocation11_spill] sm:$0xff] %v1591_v45  ;;  %2309 = vst [vmem:[#allocation12_spill] sm:$0xff] %v1595_v47  ;;  %v1609_v54 = vrot.slane %v296_v36, %v239_v11  ;;  %v1611_v55 = vrot.slane %v300_v37, %v239_v11  ;;  %v507_v56 = vrot.slane %v1547_v13, %v506_v30 }
  0x28   : > { %2310 = vst [vmem:[#allocation13_spill] sm:$0xff] %v1597_v48  ;;  %2311 = vst [vmem:[#allocation14_spill] sm:$0xff] %v1599_v49  ;;  %v511_v57 = vrot.slane %v1547_v13, %v510_v42  ;;  %v515_v58 = vrot.slane %v1549_v14, %v506_v30  ;;  %v519_v59 = vrot.slane %v1549_v14, %v510_v42 }
  0x29   : > { %501 = vperm.xlu1 %1264, %v210_v0   ;;  %1265 = vset.pattern.permute.xlu0 %v1445_v8  ;;  %2312 = vst [vmem:[#allocation15_spill] sm:$0xff] %v1601_v50  ;;  %2313 = vst [vmem:[#allocation16_spill] sm:$0xff] %v1603_v51  ;;  %v523_v60 = vrot.slane %v1551_v15, %v506_v30  ;;  %v527_v61 = vrot.slane %v1551_v15, %v510_v42 }
  0x2a   : > { %745 = vperm.xlu0 %1265, %v208_v1   ;;  %2314 = vst [vmem:[#allocation17_spill] sm:$0xff] %v1605_v52  ;;  %2315 = vst [vmem:[#allocation18_spill] sm:$0xff] %v1607_v53  ;;  %v531_v62 = vrot.slane %v1553_v16, %v506_v30  ;;  %v535_v63 = vrot.slane %v1553_v16, %v510_v42  ;;  %v543_v1 = vrot.slane %v1555_v17, %v510_v42 }
  0x2b   : > { %2316 = vst [vmem:[#allocation19_spill] sm:$0xff] %v1609_v54  ;;  %2317 = vst [vmem:[#allocation20_spill] sm:$0xff] %v1611_v55  ;;  %v547_v3 = vrot.slane %v1557_v18, %v506_v30  ;;  %v555_v5 = vrot.slane %v1559_v19, %v506_v30  ;;  %v559_v6 = vrot.slane %v1559_v19, %v510_v42 }
  0x2c   : > { %v563_v7 = vrot.slane %v1563_v22, %v506_v30  ;;  %v1629_v9 = vrot.slane %v507_v56, %v506_v30  ;;  %v1631_v11 = vrot.slane %v511_v57, %v506_v30  ;;  %v1633_v12 = vrot.slane %v515_v58, %v506_v30 }
  0x2d   : > { %1266 = vset.pattern.permute.xlu1 %v1445_v8  ;;  %v567_v8 = vrot.slane %v1563_v22, %v510_v42  ;;  %v1635_v20 = vrot.slane %v519_v59, %v506_v30  ;;  %v1637_v10 = vrot.slane %v523_v60, %v506_v30  ;;  %v1639_v21 = vrot.slane %v527_v61, %v506_v30 }
  0x2e   : > { %749 = vperm.xlu1 %1266, %v209_v4   ;;  %v551_v4 = vrot.slane %v1557_v18, %v510_v42  ;;  %2318 = vst [vmem:[#allocation21_spill] sm:$0xff] %v1629_v9  ;;  %2319 = vst [vmem:[#allocation22_spill] sm:$0xff] %v1631_v11  ;;  %v1641_v23 = vrot.slane %v531_v62, %v506_v30  ;;  %v1643_v24 = vrot.slane %v535_v63, %v506_v30 }
  0x2f   : > { %2320 = vst [vmem:[#allocation23_spill] sm:$0xff] %v1633_v12  ;;  %2321 = vst [vmem:[#allocation24_spill] sm:$0xff] %v1635_v20  ;;  %v1647_v26 = vrot.slane %v543_v1, %v506_v30  ;;  %v1649_v27 = vrot.slane %v547_v3, %v506_v30  ;;  %v1653_v29 = vrot.slane %v555_v5, %v506_v30 }
  0x30   : > { %2322 = vst [vmem:[#allocation25_spill] sm:$0xff] %v1637_v10  ;;  %2323 = vst [vmem:[#allocation26_spill] sm:$0xff] %v1639_v21  ;;  %v1651_v28 = vrot.slane %v551_v4, %v506_v30  ;;  %v1655_v31 = vrot.slane %v559_v6, %v506_v30  ;;  %v1659_v33 = vrot.slane %v563_v7, %v506_v30 }
  0x31   : > { %2324 = vst [vmem:[#allocation27_spill] sm:$0xff] %v1641_v23  ;;  %2325 = vst [vmem:[#allocation28_spill] sm:$0xff] %v1643_v24  ;;  %v1661_v34 = vrot.slane %v567_v8, %v506_v30  ;;  %v759_v35 = vrot.slane %v1547_v13, %v1593_v46  ;;  %v763_v36 = vrot.slane %v1547_v13, %v762_v2 }
  0x32   : > { %753 = vperm.xlu1 %1266, %v210_v0   ;;  %v539_v0 = vrot.slane %v1555_v17, %v506_v30  ;;  %2327 = vst [vmem:[#allocation30_spill] sm:$0xff] %v1647_v26  ;;  %2328 = vst [vmem:[#allocation31_spill] sm:$0xff] %v1649_v27  ;;  %v767_v42 = vrot.slane %v1549_v14, %v1593_v46  ;;  %v771_v56 = vrot.slane %v1549_v14, %v762_v2 }
  0x33   : > { %2329 = vst [vmem:[#allocation32_spill] sm:$0xff] %v1651_v28  ;;  %2330 = vst [vmem:[#allocation33_spill] sm:$0xff] %v1653_v29  ;;  %v775_v57 = vrot.slane %v1551_v15, %v1593_v46  ;;  %v779_v58 = vrot.slane %v1551_v15, %v762_v2  ;;  %v787_v59 = vrot.slane %v1553_v16, %v762_v2 }
  0x34   : > { %v1645_v25 = vrot.slane %v539_v0, %v506_v30  ;;  %2331 = vst [vmem:[#allocation34_spill] sm:$0xff] %v1655_v31  ;;  %2333 = vst [vmem:[#allocation36_spill] sm:$0xff] %v1659_v33  ;;  %v783_v30 = vrot.slane %v1553_v16, %v1593_v46  ;;  %v791_v60 = vrot.slane %v1555_v17, %v1593_v46 }
  0x35   : > { %v795_v13 = vrot.slane %v1555_v17, %v762_v2  ;;  %v799_v61 = vrot.slane %v1557_v18, %v1593_v46  ;;  %v803_v14 = vrot.slane %v1557_v18, %v762_v2  ;;  %v807_v62 = vrot.slane %v1559_v19, %v1593_v46 }
  0x36   : > { %2326 = vst [vmem:[#allocation29_spill] sm:$0xff] %v1645_v25  ;;  %v811_v15 = vrot.slane %v1559_v19, %v762_v2  ;;  %v815_v63 = vrot.slane %v1563_v22, %v1593_v46  ;;  %v819_v16 = vrot.slane %v1563_v22, %v762_v2  ;;  %v1688_v0 = vrot.slane %v759_v35, %v1593_v46 }
  0x37   : > { %v1691_v17 = vrot.slane %v763_v36, %v1593_v46  ;;  %v1694_v1 = vrot.slane %v767_v42, %v1593_v46  ;;  %v1697_v18 = vrot.slane %v771_v56, %v1593_v46  ;;  %v1700_v3 = vrot.slane %v775_v57, %v1593_v46 }
  0x38   : > { %2334 = vst [vmem:[#allocation37_spill] sm:$0xff] %v1688_v0  ;;  %v1703_v19 = vrot.slane %v779_v58, %v1593_v46  ;;  %v1708_v22 = vrot.slane %v783_v30, %v1593_v46  ;;  %v1711_v2 = vrot.slane %v787_v59, %v1593_v46  ;;  %v1714_v5 = vrot.slane %v791_v60, %v1593_v46 }
  0x39   : > { %2335 = vst [vmem:[#allocation38_spill] sm:$0xff] %v1691_v17  ;;  %2336 = vst [vmem:[#allocation39_spill] sm:$0xff] %v1694_v1  ;;  %v1717_v6 = vrot.slane %v795_v13, %v1593_v46  ;;  %v1720_v8 = vrot.slane %v799_v61, %v1593_v46  ;;  %v1723_v35 = vrot.slane %v803_v14, %v1593_v46 }
  0x3a   : > { %2337 = vst [vmem:[#allocation40_spill] sm:$0xff] %v1697_v18  ;;  %2338 = vst [vmem:[#allocation41_spill] sm:$0xff] %v1700_v3  ;;  %v1726_v36 = vrot.slane %v807_v62, %v1593_v46  ;;  %v1729_v42 = vrot.slane %v811_v15, %v1593_v46  ;;  %v1734_v58 = vrot.slane %v815_v63, %v1593_v46 }
  0x3b   : > { %2339 = vst [vmem:[#allocation42_spill] sm:$0xff] %v1703_v19  ;;  %2340 = vst [vmem:[#allocation43_spill] sm:$0xff] %v1708_v22  ;;  %v1737_v30 = vrot.slane %v819_v16, %v1593_v46 }
  0x3c   : > { %2341 = vst [vmem:[#allocation44_spill] sm:$0xff] %v1711_v2  ;;  %2342 = vst [vmem:[#allocation45_spill] sm:$0xff] %v1714_v5 }
  0x3d   : > { %2343 = vst [vmem:[#allocation46_spill] sm:$0xff] %v1717_v6  ;;  %2344 = vst [vmem:[#allocation47_spill] sm:$0xff] %v1720_v8 }
  0x3e   : > { %2345 = vst [vmem:[#allocation48_spill] sm:$0xff] %v1723_v35  ;;  %2346 = vst [vmem:[#allocation49_spill] sm:$0xff] %v1726_v36 }
  0x3f   : > { %2347 = vst [vmem:[#allocation50_spill] sm:$0xff] %v1729_v42  ;;  %2348 = vst [vmem:[#allocation51_spill] sm:$0xff] %v1734_v58 }
  0x40   : > { %2349 = vst [vmem:[#allocation52_spill] sm:$0xff] %v1737_v30 }
  0x97   : > { %v1657_v32 = vpop.permute.xlu1 %226  ;;  %v217_v37 = vpop.permute.xlu0 %216 }
  0x98   : > { %2332 = vst [vmem:[#allocation35_spill] sm:$0xff] %v1657_v32  ;;  %v381_v56 = vmul.f32 %v1579_v38, %v217_v37  ;;  %v382_v57 = vmul.f32 %v1581_v39, %v217_v37  ;;  %v383_v59 = vmul.f32 %v1583_v40, %v217_v37  ;;  %v384_v60 = vmul.f32 %v1585_v41, %v217_v37 }
  0x99   : > { %v1742_v13 = vmul.f32 %v1587_v43, %v217_v37  ;;  %v1745_v61 = vmul.f32 %v1589_v44, %v217_v37  ;;  %v1748_v14 = vmul.f32 %v1591_v45, %v217_v37  ;;  %v1751_v62 = vmul.f32 %v1595_v47, %v217_v37 }
  0x9a   : > { %v1754_v15 = vmul.f32 %v1597_v48, %v217_v37  ;;  %v1757_v46 = vmul.f32 %v1599_v49, %v217_v37  ;;  %v1760_v63 = vmul.f32 %v1601_v50, %v217_v37  ;;  %v1763_v16 = vmul.f32 %v1603_v51, %v217_v37 }
  0x9b   : > { %v1705_v4 = vpop.permute.xlu1 %431  ;;  %v222_v7 = vpop.permute.xlu0 %221  ;;  %v1766_v32 = vmul.f32 %v1605_v52, %v217_v37  ;;  %v1769_v30 = vmul.f32 %v1607_v53, %v217_v37  ;;  %v1776_v35 = vmul.f32 %v1609_v54, %v217_v37  ;;  %v1779_v8 = vmul.f32 %v1611_v55, %v217_v37 }
  0x9c   : > { %2350 = vst [vmem:[#allocation53_spill] sm:$0xff] %v1760_v63  ;;  %2351 = vst [vmem:[#allocation54_spill] sm:$0xff] %v1763_v16  ;;  %v397_v58 = vmul.f32 %v1579_v38, %v222_v7  ;;  %v398_v42 = vmul.f32 %v1581_v39, %v222_v7  ;;  %v399_v6 = vmul.f32 %v1583_v40, %v222_v7 }
  0x9d   : > { %2352 = vst [vmem:[#allocation55_spill] sm:$0xff] %v1766_v32  ;;  %2353 = vst [vmem:[#allocation56_spill] sm:$0xff] %v1769_v30  ;;  %v400_v5 = vmul.f32 %v1585_v41, %v222_v7  ;;  %v401_v2 = vmul.f32 %v1587_v43, %v222_v7  ;;  %v402_v22 = vmul.f32 %v1589_v44, %v222_v7 }
  0x9e   : > { %2355 = vst [vmem:[#allocation58_spill] sm:$0xff] %v1776_v35  ;;  %2356 = vst [vmem:[#allocation59_spill] sm:$0xff] %v1779_v8  ;;  %v403_v38 = vmul.f32 %v1591_v45, %v222_v7  ;;  %v404_v39 = vmul.f32 %v1595_v47, %v222_v7  ;;  %v406_v3 = vmul.f32 %v1599_v49, %v222_v7 }
  0x9f   : > { %v1773_v36 = vpop.permute.xlu1 %441  ;;  %v437_v19 = vpop.permute.xlu0 %436  ;;  %v407_v37 = vmul.f32 %v1601_v50, %v222_v7  ;;  %v408_v18 = vmul.f32 %v1603_v51, %v222_v7  ;;  %v409_v40 = vmul.f32 %v1605_v52, %v222_v7  ;;  %v410_v41 = vmul.f32 %v1607_v53, %v222_v7 }
  0xa0   : > { %2354 = vst [vmem:[#allocation57_spill] sm:$0xff] %v1773_v36  ;;  %v405_v36 = vmul.f32 %v1597_v48, %v222_v7  ;;  %v411_v43 = vmul.f32 %v1609_v54, %v222_v7  ;;  %v412_v44 = vmul.f32 %v1611_v55, %v222_v7  ;;  %v460_v1 = vadd.f32 %v437_v19, %v397_v58 }
  0xa1   : > { %v461_v45 = vadd.f32 %v437_v19, %v398_v42  ;;  %v462_v17 = vadd.f32 %v437_v19, %v399_v6  ;;  %v463_v47 = vadd.f32 %v437_v19, %v400_v5  ;;  %v464_v0 = vadd.f32 %v437_v19, %v401_v2 }
  0xa2   : > { %v465_v48 = vadd.f32 %v437_v19, %v402_v22  ;;  %v466_v8 = vadd.f32 %v437_v19, %v403_v38  ;;  %v467_v49 = vadd.f32 %v437_v19, %v404_v39  ;;  %v468_v35 = vadd.f32 %v437_v19, %v405_v36 }
  0xa3   : > { %v469_v50 = vadd.f32 %v437_v19, %v406_v3  ;;  %v470_v51 = vadd.f32 %v437_v19, %v407_v37  ;;  %v471_v32 = vadd.f32 %v437_v19, %v408_v18  ;;  %v472_v52 = vadd.f32 %v437_v19, %v409_v40 }
  0xa4   : > { %v498_v30 = vpop.permute.xlu1 %497  ;;  %v473_v16 = vadd.f32 %v437_v19, %v410_v41  ;;  %v474_v53 = vadd.f32 %v437_v19, %v411_v43  ;;  %v1795_v63 = vadd.f32 %v437_v19, %v412_v44  ;;  %v444_v7 = vadd.f32 %v1705_v4, %v381_v56  ;;  %v494_v58 = vpop.permute.xlu0 %493 }
  0xa5   : > { %v1799_v42 = vadd.f32 %v1705_v4, %v382_v57  ;;  %v664_v2 = vmul.f32 %v1629_v9, %v498_v30  ;;  %v665_v38 = vmul.f32 %v1631_v11, %v498_v30  ;;  %v1804_v39 = vadd.f32 %v1705_v4, %v383_v59 }
  0xa6   : > { %2357 = vst [vmem:[#allocation60_spill] sm:$0xff] %v1795_v63  ;;  %v1807_v3 = vadd.f32 %v1705_v4, %v384_v60  ;;  %v666_v40 = vmul.f32 %v1633_v12, %v498_v30  ;;  %v667_v41 = vmul.f32 %v1635_v20, %v498_v30  ;;  %v668_v43 = vmul.f32 %v1637_v10, %v498_v30 }
  0xa7   : > { %2358 = vst [vmem:[#allocation61_spill] sm:$0xff] %v1799_v42  ;;  %2359 = vst [vmem:[#allocation62_spill] sm:$0xff] %v1804_v39  ;;  %v669_v44 = vmul.f32 %v1639_v21, %v498_v30  ;;  %v670_v18 = vmul.f32 %v1641_v23, %v498_v30  ;;  %v671_v19 = vmul.f32 %v1643_v24, %v498_v30 }
  0xa8   : > { %2360 = vst [vmem:[#allocation63_spill] sm:$0xff] %v1807_v3  ;;  %v672_v22 = vmul.f32 %v1645_v25, %v498_v30  ;;  %v673_v5 = vmul.f32 %v1647_v26, %v498_v30  ;;  %v674_v6 = vmul.f32 %v1649_v27, %v498_v30  ;;  %v675_v36 = vmul.f32 %v1651_v28, %v498_v30 }
  0xa9   : > { %v676_v56 = vmul.f32 %v1653_v29, %v498_v30  ;;  %v677_v57 = vmul.f32 %v1655_v31, %v498_v30  ;;  %v678_v59 = vmul.f32 %v1659_v33, %v498_v30  ;;  %v1823_v60 = vmul.f32 %v1661_v34, %v498_v30 }
  0xaa   : > { %v1825_v37 = vadd.f32 %v664_v2, %v460_v1  ;;  %v1827_v55 = vadd.f32 %v665_v38, %v461_v45  ;;  %v1829_v54 = vadd.f32 %v666_v40, %v462_v17  ;;  %v1831_v63 = vadd.f32 %v667_v41, %v463_v47  ;;  %v2372_v2 = vld [vmem:[#allocation56_spill] sm:$0xff]  ;;  %v2373_v40 = vld [vmem:[#allocation58_spill] sm:$0xff] }
  0xab   : > { %v1833_v3 = vadd.f32 %v668_v43, %v464_v0  ;;  %v1835_v39 = vadd.f32 %v669_v44, %v465_v48  ;;  %v1837_v42 = vadd.f32 %v670_v18, %v466_v8  ;;  %v1839_v31 = vadd.f32 %v671_v19, %v467_v49  ;;  %v1861_v8 = vpop.permute.xlu0 %745 }
  0xac   : > { %v1841_v33 = vadd.f32 %v672_v22, %v468_v35  ;;  %v1843_v30 = vadd.f32 %v673_v5, %v469_v50  ;;  %v1845_v1 = vadd.f32 %v674_v6, %v470_v51  ;;  %v1847_v45 = vadd.f32 %v675_v36, %v471_v32  ;;  %v2369_v32 = vld [vmem:[#allocation53_spill] sm:$0xff] }
  0xad   : > { %2361 = vst [vmem:[#allocation64_spill] sm:$0xff] %v1839_v31  ;;  %v1849_v17 = vadd.f32 %v676_v56, %v472_v52  ;;  %v1851_v47 = vadd.f32 %v677_v57, %v473_v16  ;;  %v1853_v0 = vadd.f32 %v678_v59, %v474_v53  ;;  %v448_v48 = vadd.f32 %v1705_v4, %v1742_v13  ;;  %v2370_v13 = vld [vmem:[#allocation54_spill] sm:$0xff]  ;;  %v2371_v16 = vld [vmem:[#allocation55_spill] sm:$0xff]  ;;  %v2375_v5 = vld [vmem:[#allocation37_spill] sm:$0xff] }
  0xae   : > { %2362 = vst [vmem:[#allocation65_spill] sm:$0xff] %v1841_v33  ;;  %2363 = vst [vmem:[#allocation66_spill] sm:$0xff] %v1843_v30  ;;  %v449_v49 = vadd.f32 %v1705_v4, %v1745_v61  ;;  %v450_v50 = vadd.f32 %v1705_v4, %v1748_v14  ;;  %v451_v51 = vadd.f32 %v1705_v4, %v1751_v62  ;;  %v2376_v57 = vld [vmem:[#allocation38_spill] sm:$0xff]  ;;  %v2388_v33 = vld [vmem:[#allocation45_spill] sm:$0xff] }
  0xaf   : > { %2364 = vst [vmem:[#allocation67_spill] sm:$0xff] %v1845_v1  ;;  %2365 = vst [vmem:[#allocation68_spill] sm:$0xff] %v1847_v45  ;;  %v452_v52 = vadd.f32 %v1705_v4, %v1754_v15  ;;  %v453_v53 = vadd.f32 %v1705_v4, %v1757_v46  ;;  %v454_v35 = vadd.f32 %v1705_v4, %v2369_v32  ;;  %v2374_v46 = vld [vmem:[#allocation59_spill] sm:$0xff] }
  0xb0   : > { %2366 = vst [vmem:[#allocation69_spill] sm:$0xff] %v1849_v17  ;;  %2367 = vst [vmem:[#allocation70_spill] sm:$0xff] %v1851_v47  ;;  %v455_v61 = vadd.f32 %v1705_v4, %v2370_v13  ;;  %v456_v14 = vadd.f32 %v1705_v4, %v2371_v16  ;;  %v1877_v38 = vadd.f32 %v1705_v4, %v2372_v2  ;;  %v2377_v2 = vld [vmem:[#allocation39_spill] sm:$0xff] }
  0xb1   : > { %2368 = vst [vmem:[#allocation71_spill] sm:$0xff] %v1853_v0  ;;  %v648_v62 = vmul.f32 %v1629_v9, %v494_v58  ;;  %v1882_v15 = vadd.f32 %v1705_v4, %v2373_v40  ;;  %v1886_v41 = vadd.f32 %v1705_v4, %v2374_v46  ;;  %v649_v43 = vmul.f32 %v1631_v11, %v494_v58  ;;  %v2381_v11 = vld [vmem:[#allocation62_spill] sm:$0xff]  ;;  %v2384_v47 = vld [vmem:[#allocation63_spill] sm:$0xff] }
  0xb2   : > { %v650_v44 = vmul.f32 %v1633_v12, %v494_v58  ;;  %v651_v18 = vmul.f32 %v1635_v20, %v494_v58  ;;  %v652_v19 = vmul.f32 %v1637_v10, %v494_v58  ;;  %v653_v22 = vmul.f32 %v1639_v21, %v494_v58  ;;  %v2380_v20 = vld [vmem:[#allocation34_spill] sm:$0xff] }
  0xb3   : > { %v900_v6 = vmul.f32 %v2375_v5, %v1861_v8  ;;  %v654_v36 = vmul.f32 %v1641_v23, %v494_v58  ;;  %v655_v56 = vmul.f32 %v1643_v24, %v494_v58  ;;  %v656_v4 = vmul.f32 %v1645_v25, %v494_v58  ;;  %v2378_v23 = vld [vmem:[#allocation61_spill] sm:$0xff]  ;;  %v2379_v24 = vld [vmem:[#allocation40_spill] sm:$0xff] }
  0xb4   : > { %v901_v59 = vmul.f32 %v2376_v57, %v1861_v8  ;;  %v657_v32 = vmul.f32 %v1647_v26, %v494_v58  ;;  %v658_v13 = vmul.f32 %v1649_v27, %v494_v58  ;;  %v696_v16 = vadd.f32 %v648_v62, %v444_v7  ;;  %v2382_v26 = vld [vmem:[#allocation41_spill] sm:$0xff]  ;;  %v2383_v62 = vld [vmem:[#allocation36_spill] sm:$0xff] }
  0xb5   : > { %v902_v40 = vmul.f32 %v2377_v2, %v1861_v8  ;;  %v659_v46 = vmul.f32 %v1651_v28, %v494_v58  ;;  %v660_v21 = vmul.f32 %v1653_v29, %v494_v58  ;;  %v697_v10 = vadd.f32 %v649_v43, %v2378_v23  ;;  %v2385_v28 = vld [vmem:[#allocation42_spill] sm:$0xff] }
  0xb6   : > { %v903_v25 = vmul.f32 %v2379_v24, %v1861_v8  ;;  %v661_v12 = vmul.f32 %v2380_v20, %v494_v58  ;;  %v698_v9 = vadd.f32 %v650_v44, %v2381_v11  ;;  %v904_v27 = vmul.f32 %v2382_v26, %v1861_v8  ;;  %v2386_v20 = vld [vmem:[#allocation43_spill] sm:$0xff]  ;;  %v1920_v44 = vpop.permute.xlu1 %501 }
  0xb7   : > { %v948_v7 = vadd.f32 %v900_v6, %v696_v16  ;;  %v662_v0 = vmul.f32 %v2383_v62, %v494_v58  ;;  %v699_v17 = vadd.f32 %v651_v18, %v2384_v47  ;;  %v905_v29 = vmul.f32 %v2385_v28, %v1861_v8  ;;  %v2387_v16 = vld [vmem:[#allocation44_spill] sm:$0xff] }
  0xb8   : > { %v949_v23 = vadd.f32 %v901_v59, %v697_v10  ;;  %v663_v43 = vmul.f32 %v1661_v34, %v494_v58  ;;  %v700_v45 = vadd.f32 %v652_v19, %v448_v48  ;;  %v906_v1 = vmul.f32 %v2386_v20, %v1861_v8  ;;  %v2389_v48 = vld [vmem:[#allocation46_spill] sm:$0xff]  ;;  %v2394_v59 = vld [vmem:[#allocation51_spill] sm:$0xff] }
  0xb9   : > { %v950_v11 = vadd.f32 %v902_v40, %v698_v9  ;;  %v701_v30 = vadd.f32 %v653_v22, %v449_v49  ;;  %v702_v6 = vadd.f32 %v654_v36, %v450_v50  ;;  %v907_v62 = vmul.f32 %v2387_v16, %v1861_v8  ;;  %v2390_v50 = vld [vmem:[#allocation47_spill] sm:$0xff] }
  0xba   : > { %v951_v47 = vadd.f32 %v903_v25, %v699_v17  ;;  %v703_v18 = vadd.f32 %v655_v56, %v451_v51  ;;  %v908_v31 = vmul.f32 %v2388_v33, %v1861_v8  ;;  %v952_v10 = vadd.f32 %v904_v27, %v700_v45  ;;  %v2391_v17 = vld [vmem:[#allocation48_spill] sm:$0xff]  ;;  %v2392_v45 = vld [vmem:[#allocation49_spill] sm:$0xff] }
  0xbb   : > { %1267 = vtanh.f32 %v948_v7  ;;  %v704_v58 = vadd.f32 %v656_v4, %v452_v52  ;;  %v909_v9 = vmul.f32 %v2389_v48, %v1861_v8  ;;  %v953_v19 = vadd.f32 %v905_v29, %v701_v30 }
  0xbc   : > { %1269 = vtanh.f32 %v949_v23  ;;  %v705_v49 = vadd.f32 %v657_v32, %v453_v53  ;;  %v910_v22 = vmul.f32 %v2390_v50, %v1861_v8  ;;  %v954_v36 = vadd.f32 %v906_v1, %v702_v6  ;;  %v2393_v53 = vld [vmem:[#allocation50_spill] sm:$0xff]  ;;  %v2396_v23 = vld [vmem:[#allocation60_spill] sm:$0xff] }
  0xbd   : > { %1271 = vtanh.f32 %v950_v11  ;;  %v706_v25 = vadd.f32 %v658_v13, %v454_v35  ;;  %v911_v51 = vmul.f32 %v2391_v17, %v1861_v8  ;;  %v955_v56 = vadd.f32 %v907_v62, %v703_v18  ;;  %v750_v35 = vpop.permute.xlu1 %749  ;;  %v2395_v13 = vld [vmem:[#allocation52_spill] sm:$0xff] }
  0xbe   : > { %1273 = vtanh.f32 %v951_v47  ;;  %v707_v27 = vadd.f32 %v659_v46, %v455_v61  ;;  %v912_v29 = vmul.f32 %v2392_v45, %v1861_v8  ;;  %v956_v30 = vadd.f32 %v908_v31, %v704_v58 }
  0xbf   : > { %1275 = vtanh.f32 %v952_v10  ;;  %v708_v52 = vadd.f32 %v660_v21, %v456_v14  ;;  %v913_v1 = vmul.f32 %v2393_v53, %v1861_v8  ;;  %v957_v4 = vadd.f32 %v909_v9, %v705_v49 }
  0xc0   : > { %1277 = vtanh.f32 %v953_v19  ;;  %v914_v32 = vmul.f32 %v2394_v59, %v1861_v8  ;;  %v915_v40 = vmul.f32 %v2395_v13, %v1861_v8  ;;  %v958_v7 = vadd.f32 %v910_v22, %v706_v25 }
  0xc1   : > { %1279 = vtanh.f32 %v954_v36  ;;  %v709_v61 = vadd.f32 %v661_v12, %v1877_v38  ;;  %v710_v31 = vadd.f32 %v662_v0, %v1882_v15  ;;  %v959_v46 = vadd.f32 %v911_v51, %v707_v27 }
  0xc2   : > { %1281 = vtanh.f32 %v955_v56  ;;  %v711_v21 = vadd.f32 %v663_v43, %v1886_v41  ;;  %v960_v14 = vadd.f32 %v912_v29, %v708_v52  ;;  %v916_v62 = vmul.f32 %v2375_v5, %v750_v35 }
  0xc3   : > { %1283 = vtanh.f32 %v956_v30  ;;  %v1951_v11 = vadd.f32 %v1823_v60, %v2396_v23  ;;  %v961_v8 = vadd.f32 %v913_v1, %v709_v61  ;;  %v917_v6 = vmul.f32 %v2376_v57, %v750_v35  ;;  %v2397_v61 = vld [vmem:[#allocation64_spill] sm:$0xff] }
  0xc4   : > { %1285 = vtanh.f32 %v957_v4  ;;  %v962_v38 = vadd.f32 %v914_v32, %v710_v31  ;;  %v963_v0 = vadd.f32 %v915_v40, %v711_v21  ;;  %v918_v15 = vmul.f32 %v2377_v2, %v750_v35 }
  0xc5   : > { %v1268_v12 = vpop.eup %1267  ;;  %1287 = vtanh.f32 %v958_v7  ;;  %v919_v60 = vmul.f32 %v2379_v24, %v750_v35  ;;  %v920_v41 = vmul.f32 %v2382_v26, %v750_v35  ;;  %v921_v43 = vmul.f32 %v2385_v28, %v750_v35 }
  0xc6   : > { %v1270_v47 = vpop.eup %1269  ;;  %1289 = vtanh.f32 %v959_v46  ;;  %1044 = vst [vmem:[%s1956_s28] sm:$0xff] %v1268_v12  ;;  %v922_v10 = vmul.f32 %v2386_v20, %v750_v35  ;;  %v923_v58 = vmul.f32 %v2387_v16, %v750_v35  ;;  %v964_v9 = vadd.f32 %v916_v62, %v1825_v37  ;;  %v2398_v46 = vld [vmem:[#allocation65_spill] sm:$0xff]  ;;  %v2400_v62 = vld [vmem:[#allocation67_spill] sm:$0xff]  ;;  %v2403_v12 = vld [vmem:[#allocation70_spill] sm:$0xff] }
  0xc7   : > { %v1272_v18 = vpop.eup %1271  ;;  %1291 = vtanh.f32 %v960_v14  ;;  %1045 = vst [vmem:[%s1956_s28 + $0x8] sm:$0xff] %v1270_v47  ;;  %v924_v49 = vmul.f32 %v2388_v33, %v750_v35  ;;  %v925_v22 = vmul.f32 %v2389_v48, %v750_v35  ;;  %v965_v36 = vadd.f32 %v917_v6, %v1827_v55  ;;  %v2399_v14 = vld [vmem:[#allocation66_spill] sm:$0xff]  ;;  %v2402_v6 = vld [vmem:[#allocation69_spill] sm:$0xff] }
  0xc8   : > { %v1274_v19 = vpop.eup %1273  ;;  %1293 = vtanh.f32 %v961_v8  ;;  %1046 = vst [vmem:[%s1956_s28 + $0x10] sm:$0xff] %v1272_v18  ;;  %v926_v51 = vmul.f32 %v2390_v50, %v750_v35  ;;  %v927_v56 = vmul.f32 %v2391_v17, %v750_v35  ;;  %v966_v37 = vadd.f32 %v918_v15, %v1829_v54  ;;  %v2401_v8 = vld [vmem:[#allocation68_spill] sm:$0xff]  ;;  %v2404_v15 = vld [vmem:[#allocation71_spill] sm:$0xff] }
  0xc9   : > { %v1276_v25 = vpop.eup %1275  ;;  %1295 = vtanh.f32 %v962_v38  ;;  %1047 = vst [vmem:[%s1956_s28 + $0x18] sm:$0xff] %v1274_v19  ;;  %v928_v29 = vmul.f32 %v2392_v45, %v750_v35  ;;  %v929_v30 = vmul.f32 %v2393_v53, %v750_v35  ;;  %v967_v55 = vadd.f32 %v919_v60, %v1831_v63  ;;  %v2408_v19 = vld [vmem:[#allocation7_spill] sm:$0xff] }
  0xca   : > { %v1278_v27 = vpop.eup %1277  ;;  %1297 = vtanh.f32 %v963_v0  ;;  %1048 = vst [vmem:[%s1956_s28 + $0x20] sm:$0xff] %v1276_v25  ;;  %v930_v1 = vmul.f32 %v2394_v59, %v750_v35  ;;  %v931_v4 = vmul.f32 %v2395_v13, %v750_v35  ;;  %v968_v32 = vadd.f32 %v920_v41, %v1833_v3  ;;  %v2405_v41 = vld [vmem:[#allocation35_spill] sm:$0xff]  ;;  %v2410_v25 = vld [vmem:[#allocation9_spill] sm:$0xff] }
  0xcb   : > { %v1280_v52 = vpop.eup %1279  ;;  %1049 = vst [vmem:[%s1956_s28 + $0x28] sm:$0xff] %v1278_v27  ;;  %1299 = vtanh.f32 %v964_v9  ;;  %v969_v40 = vadd.f32 %v921_v43, %v1835_v39  ;;  %v970_v7 = vadd.f32 %v922_v10, %v1837_v42  ;;  %v971_v31 = vadd.f32 %v923_v58, %v2397_v61  ;;  %v2406_v43 = vld [vmem:[#allocation5_spill] sm:$0xff]  ;;  %v2407_v58 = vld [vmem:[#allocation6_spill] sm:$0xff]  ;;  %v2412_v27 = vld [vmem:[#allocation11_spill] sm:$0xff] }
  0xcc   : > { %v1282_v54 = vpop.eup %1281  ;;  %1050 = vst [vmem:[%s1956_s28 + $0x30] sm:$0xff] %v1280_v52  ;;  %1301 = vtanh.f32 %v965_v36  ;;  %v972_v21 = vadd.f32 %v924_v49, %v2398_v46  ;;  %v973_v35 = vadd.f32 %v925_v22, %v2399_v14  ;;  %v974_v3 = vadd.f32 %v926_v51, %v2400_v62  ;;  %v2409_v22 = vld [vmem:[#allocation8_spill] sm:$0xff] }
  0xcd   : > { %v1284_v63 = vpop.eup %1283  ;;  %1051 = vst [vmem:[%s1956_s28 + $0x38] sm:$0xff] %v1282_v54  ;;  %1303 = vtanh.f32 %v966_v37  ;;  %v975_v39 = vadd.f32 %v927_v56, %v2401_v8  ;;  %v976_v42 = vadd.f32 %v928_v29, %v2402_v6  ;;  %v977_v38 = vadd.f32 %v929_v30, %v2403_v12  ;;  %v2411_v56 = vld [vmem:[#allocation10_spill] sm:$0xff]  ;;  %v2420_v6 = vld [vmem:[#allocation19_spill] sm:$0xff] }
  0xce   : > { %v1286_v23 = vpop.eup %1285  ;;  %1052 = vst [vmem:[%s1956_s28 + $0x40] sm:$0xff] %v1284_v63  ;;  %1305 = vtanh.f32 %v967_v55  ;;  %v978_v47 = vadd.f32 %v930_v1, %v2404_v15  ;;  %v1997_v60 = vadd.f32 %v931_v4, %v1951_v11  ;;  %v413_v18 = vmul.f32 %v2406_v43, %v2405_v41  ;;  %v2413_v55 = vld [vmem:[#allocation12_spill] sm:$0xff]  ;;  %v2414_v1 = vld [vmem:[#allocation13_spill] sm:$0xff] }
  0xcf   : > { %v1288_v0 = vpop.eup %1287  ;;  %1053 = vst [vmem:[%s1956_s28 + $0x48] sm:$0xff] %v1286_v23  ;;  %1307 = vtanh.f32 %v968_v32  ;;  %v414_v9 = vmul.f32 %v2407_v58, %v2405_v41  ;;  %v415_v49 = vmul.f32 %v2408_v19, %v2405_v41  ;;  %v416_v36 = vmul.f32 %v2409_v22, %v2405_v41  ;;  %v2415_v32 = vld [vmem:[#allocation14_spill] sm:$0xff]  ;;  %v2417_v63 = vld [vmem:[#allocation16_spill] sm:$0xff]  ;;  %v2422_v43 = vld [vmem:[#allocation57_spill] sm:$0xff] }
  0xd0   : > { %v1290_v10 = vpop.eup %1289  ;;  %1054 = vst [vmem:[%s1956_s28 + $0x50] sm:$0xff] %v1288_v0  ;;  %1309 = vtanh.f32 %v969_v40  ;;  %v417_v51 = vmul.f32 %v2410_v25, %v2405_v41  ;;  %v418_v37 = vmul.f32 %v2411_v56, %v2405_v41  ;;  %v419_v29 = vmul.f32 %v2412_v27, %v2405_v41  ;;  %v2419_v23 = vld [vmem:[#allocation18_spill] sm:$0xff]  ;;  %v2423_v27 = vld [vmem:[#allocation21_spill] sm:$0xff] }
  0xd1   : > { %v1292_v11 = vpop.eup %1291  ;;  %1055 = vst [vmem:[%s1956_s28 + $0x58] sm:$0xff] %v1290_v10  ;;  %1311 = vtanh.f32 %v970_v7  ;;  %v420_v52 = vmul.f32 %v2413_v55, %v2405_v41  ;;  %v421_v4 = vmul.f32 %v2414_v1, %v2405_v41  ;;  %v422_v54 = vmul.f32 %v2415_v32, %v2405_v41  ;;  %v2416_v7 = vld [vmem:[#allocation15_spill] sm:$0xff] }
  0xd2   : > { %v1294_v30 = vpop.eup %1293  ;;  %1056 = vst [vmem:[%s1956_s28 + $0x60] sm:$0xff] %v1292_v11  ;;  %1313 = vtanh.f32 %v971_v31  ;;  %v423_v61 = vmul.f32 %v2416_v7, %v2405_v41  ;;  %v424_v46 = vmul.f32 %v2417_v63, %v2405_v41  ;;  %v2418_v31 = vld [vmem:[#allocation17_spill] sm:$0xff]  ;;  %v426_v8 = vmul.f32 %v2419_v23, %v2405_v41  ;;  %v2425_v32 = vld [vmem:[#allocation23_spill] sm:$0xff] }
  0xd3   : > { %v1296_v40 = vpop.eup %1295  ;;  %1057 = vst [vmem:[%s1956_s28 + $0x68] sm:$0xff] %v1294_v30  ;;  %1315 = vtanh.f32 %v972_v21  ;;  %v425_v14 = vmul.f32 %v2418_v31, %v2405_v41  ;;  %v427_v12 = vmul.f32 %v2420_v6, %v2405_v41  ;;  %v2421_v21 = vld [vmem:[#allocation20_spill] sm:$0xff]  ;;  %v476_v10 = vadd.f32 %v2422_v43, %v413_v18  ;;  %v2428_v31 = vld [vmem:[#allocation26_spill] sm:$0xff] }
  0xd4   : > { %v1298_v62 = vpop.eup %1297  ;;  %1058 = vst [vmem:[%s1956_s28 + $0x70] sm:$0xff] %v1296_v40  ;;  %1317 = vtanh.f32 %v973_v35  ;;  %v428_v0 = vmul.f32 %v2421_v21, %v2405_v41  ;;  %v477_v58 = vadd.f32 %v2422_v43, %v414_v9  ;;  %v478_v35 = vadd.f32 %v2422_v43, %v415_v49  ;;  %v2426_v40 = vld [vmem:[#allocation24_spill] sm:$0xff] }
  0xd5   : > { %v1300_v15 = vpop.eup %1299  ;;  %1059 = vst [vmem:[%s1956_s28 + $0x78] sm:$0xff] %v1298_v62  ;;  %1319 = vtanh.f32 %v974_v3  ;;  %v479_v22 = vadd.f32 %v2422_v43, %v416_v36  ;;  %v2043_v11 = vadd.f32 %v2422_v43, %v417_v51  ;;  %v2046_v41 = vadd.f32 %v2422_v43, %v418_v37  ;;  %v2059_v36 = vpop.permute.xlu1 %753  ;;  %v2429_v62 = vld [vmem:[#allocation27_spill] sm:$0xff] }
  0xd6   : > { %v1302_v19 = vpop.eup %1301  ;;  %1321 = vtanh.f32 %v975_v39  ;;  %1060 = vst [vmem:[%s1956_s28 + $0x80] sm:$0xff] %v1300_v15  ;;  %v2050_v18 = vadd.f32 %v2422_v43, %v419_v29  ;;  %v2053_v9 = vadd.f32 %v2422_v43, %v420_v52  ;;  %v2056_v39 = vadd.f32 %v2422_v43, %v421_v4  ;;  %v2424_v52 = vld [vmem:[#allocation22_spill] sm:$0xff] }
  0xd7   : > { %v1304_v3 = vpop.eup %1303  ;;  %1323 = vtanh.f32 %v976_v42  ;;  %1061 = vst [vmem:[%s1956_s28 + $0x88] sm:$0xff] %v1302_v19  ;;  %v2062_v25 = vadd.f32 %v2422_v43, %v422_v54  ;;  %v2065_v42 = vadd.f32 %v2422_v43, %v423_v61  ;;  %v2068_v51 = vadd.f32 %v2422_v43, %v424_v46  ;;  %v2432_v15 = vld [vmem:[#allocation30_spill] sm:$0xff] }
  0xd8   : > { %v1306_v49 = vpop.eup %1305  ;;  %1325 = vtanh.f32 %v977_v38  ;;  %1062 = vst [vmem:[%s1956_s28 + $0x90] sm:$0xff] %v1304_v3  ;;  %v2072_v37 = vadd.f32 %v2422_v43, %v425_v14  ;;  %v2075_v38 = vadd.f32 %v2422_v43, %v426_v8  ;;  %v680_v29 = vmul.f32 %v2423_v27, %v1920_v44  ;;  %v2430_v8 = vld [vmem:[#allocation28_spill] sm:$0xff] }
  0xd9   : > { %v1308_v56 = vpop.eup %1307  ;;  %1327 = vtanh.f32 %v978_v47  ;;  %1063 = vst [vmem:[%s1956_s28 + $0x98] sm:$0xff] %v1306_v49  ;;  %v2082_v55 = vadd.f32 %v2422_v43, %v427_v12  ;;  %v2085_v47 = vadd.f32 %v2422_v43, %v428_v0  ;;  %v681_v1 = vmul.f32 %v2424_v52, %v1920_v44  ;;  %v2431_v0 = vld [vmem:[#allocation29_spill] sm:$0xff] }
  0xda   : > { %v1310_v30 = vpop.eup %1309  ;;  %1329 = vtanh.f32 %v1997_v60  ;;  %1064 = vst [vmem:[%s1956_s28 + $0xa0] sm:$0xff] %v1308_v56  ;;  %v682_v54 = vmul.f32 %v2425_v32, %v1920_v44  ;;  %v683_v7 = vmul.f32 %v2426_v40, %v1920_v44  ;;  %v2427_v60 = vld [vmem:[#allocation25_spill] sm:$0xff]  ;;  %v932_v63 = vmul.f32 %v2375_v5, %v2059_v36  ;;  %v2433_v56 = vld [vmem:[#allocation31_spill] sm:$0xff] }
  0xdb   : > { %v1312_v4 = vpop.eup %1311  ;;  %1065 = vst [vmem:[%s1956_s28 + $0xa8] sm:$0xff] %v1310_v30  ;;  %v684_v61 = vmul.f32 %v2427_v60, %v1920_v44  ;;  %v685_v14 = vmul.f32 %v2428_v31, %v1920_v44  ;;  %v686_v23 = vmul.f32 %v2429_v62, %v1920_v44  ;;  %v687_v6 = vmul.f32 %v2430_v8, %v1920_v44  ;;  %v2436_v31 = vld [vmem:[#allocation34_spill] sm:$0xff] }
  0xdc   : > { %v1314_v46 = vpop.eup %1313  ;;  %1066 = vst [vmem:[%s1956_s28 + $0xb0] sm:$0xff] %v1312_v4  ;;  %v933_v12 = vmul.f32 %v2376_v57, %v2059_v36  ;;  %v688_v5 = vmul.f32 %v2431_v0, %v1920_v44  ;;  %v689_v43 = vmul.f32 %v2432_v15, %v1920_v44  ;;  %v728_v19 = vadd.f32 %v680_v29, %v476_v10  ;;  %v2434_v57 = vld [vmem:[#allocation32_spill] sm:$0xff]  ;;  %v2435_v10 = vld [vmem:[#allocation33_spill] sm:$0xff] }
  0xdd   : > { %v1316_v21 = vpop.eup %1315  ;;  %1067 = vst [vmem:[%s1956_s28 + $0xb8] sm:$0xff] %v1314_v46  ;;  %v934_v3 = vmul.f32 %v2377_v2, %v2059_v36  ;;  %v690_v27 = vmul.f32 %v2433_v56, %v1920_v44  ;;  %v691_v30 = vmul.f32 %v2434_v57, %v1920_v44  ;;  %v729_v52 = vadd.f32 %v681_v1, %v477_v58 }
  0xde   : > { %v1318_v49 = vpop.eup %1317  ;;  %1068 = vst [vmem:[%s1956_s28 + $0xc0] sm:$0xff] %v1316_v21  ;;  %v935_v4 = vmul.f32 %v2379_v24, %v2059_v36  ;;  %v692_v29 = vmul.f32 %v2435_v10, %v1920_v44  ;;  %v730_v40 = vadd.f32 %v682_v54, %v478_v35  ;;  %v936_v2 = vmul.f32 %v2382_v26, %v2059_v36  ;;  %v2437_v35 = vld [vmem:[#allocation36_spill] sm:$0xff] }
  0xdf   : > { %v1320_v32 = vpop.eup %1319  ;;  %1069 = vst [vmem:[%s1956_s28 + $0xc8] sm:$0xff] %v1318_v49  ;;  %v980_v60 = vadd.f32 %v932_v63, %v728_v19  ;;  %v693_v62 = vmul.f32 %v2436_v31, %v1920_v44  ;;  %v731_v58 = vadd.f32 %v683_v7, %v479_v22  ;;  %v937_v24 = vmul.f32 %v2385_v28, %v2059_v36 }
  0xe0   : > { %v1322_v46 = vpop.eup %1321  ;;  %1070 = vst [vmem:[%s1956_s28 + $0xd0] sm:$0xff] %v1320_v32  ;;  %v981_v1 = vadd.f32 %v933_v12, %v729_v52  ;;  %v694_v54 = vmul.f32 %v2437_v35, %v1920_v44  ;;  %v732_v21 = vadd.f32 %v684_v61, %v2043_v11  ;;  %v938_v26 = vmul.f32 %v2386_v20, %v2059_v36 }
  0xe1   : > { %v1324_v8 = vpop.eup %1323  ;;  %1071 = vst [vmem:[%s1956_s28 + $0xd8] sm:$0xff] %v1322_v46  ;;  %v982_v63 = vadd.f32 %v934_v3, %v730_v40  ;;  %v695_v22 = vmul.f32 %v1661_v34, %v1920_v44  ;;  %v733_v28 = vadd.f32 %v685_v14, %v2046_v41  ;;  %v939_v7 = vmul.f32 %v2387_v16, %v2059_v36 }
  0xe2   : > { %v1326_v0 = vpop.eup %1325  ;;  %1072 = vst [vmem:[%s1956_s28 + $0xe0] sm:$0xff] %v1324_v8  ;;  %v983_v12 = vadd.f32 %v935_v4, %v731_v58  ;;  %v734_v11 = vadd.f32 %v686_v23, %v2050_v18  ;;  %v940_v20 = vmul.f32 %v2388_v33, %v2059_v36  ;;  %v984_v61 = vadd.f32 %v936_v2, %v732_v21 }
  0xe3   : > { %v1328_v15 = vpop.eup %1327  ;;  %1073 = vst [vmem:[%s1956_s28 + $0xe8] sm:$0xff] %v1326_v0  ;;  %1331 = vtanh.f32 %v980_v60  ;;  %v735_v34 = vadd.f32 %v687_v6, %v2053_v9  ;;  %v941_v44 = vmul.f32 %v2389_v48, %v2059_v36  ;;  %v985_v41 = vadd.f32 %v937_v24, %v733_v28 }
  0xe4   : > { %v1330_v19 = vpop.eup %1329  ;;  %1074 = vst [vmem:[%s1956_s28 + $0xf0] sm:$0xff] %v1328_v15  ;;  %1333 = vtanh.f32 %v981_v1  ;;  %v736_v16 = vadd.f32 %v688_v5, %v2056_v39  ;;  %v942_v18 = vmul.f32 %v2390_v50, %v2059_v36  ;;  %v986_v14 = vadd.f32 %v938_v26, %v734_v11 }
  0xe5   : > { %1075 = vst [vmem:[%s1956_s28 + $0xf8] sm:$0xff] %v1330_v19  ;;  %1335 = vtanh.f32 %v982_v63  ;;  %v737_v33 = vadd.f32 %v689_v43, %v2062_v25  ;;  %v943_v23 = vmul.f32 %v2391_v17, %v2059_v36  ;;  %v987_v3 = vadd.f32 %v939_v7, %v735_v34 }
  0xe6   : > { %1337 = vtanh.f32 %v983_v12  ;;  %v738_v9 = vadd.f32 %v690_v27, %v2065_v42  ;;  %v944_v48 = vmul.f32 %v2392_v45, %v2059_v36  ;;  %v988_v6 = vadd.f32 %v940_v20, %v736_v16 }
  0xe7   : > { %1339 = vtanh.f32 %v984_v61  ;;  %v739_v39 = vadd.f32 %v691_v30, %v2068_v51  ;;  %v945_v50 = vmul.f32 %v2393_v53, %v2059_v36  ;;  %v989_v5 = vadd.f32 %v941_v44, %v737_v33 }
  0xe8   : > { %1341 = vtanh.f32 %v985_v41  ;;  %v740_v25 = vadd.f32 %v692_v29, %v2072_v37  ;;  %v946_v17 = vmul.f32 %v2394_v59, %v2059_v36  ;;  %v990_v43 = vadd.f32 %v942_v18, %v738_v9 }
  0xe9   : > { %1343 = vtanh.f32 %v986_v14  ;;  %v741_v42 = vadd.f32 %v693_v62, %v2075_v38  ;;  %v947_v45 = vmul.f32 %v2395_v13, %v2059_v36  ;;  %v991_v49 = vadd.f32 %v943_v23, %v739_v39 }
  0xea   : > { %1345 = vtanh.f32 %v987_v3  ;;  %v742_v53 = vadd.f32 %v694_v54, %v2082_v55  ;;  %v992_v51 = vadd.f32 %v944_v48, %v740_v25  ;;  %v743_v37 = vadd.f32 %v695_v22, %v2085_v47 }
  0xeb   : > { %1347 = vtanh.f32 %v988_v6  ;;  %v993_v56 = vadd.f32 %v945_v50, %v741_v42 }
  0xec   : > { %1349 = vtanh.f32 %v989_v5  ;;  %v994_v27 = vadd.f32 %v946_v17, %v742_v53  ;;  %v995_v57 = vadd.f32 %v947_v45, %v743_v37 }
  0xed   : > { %v1332_v59 = vpop.eup %1331  ;;  %1351 = vtanh.f32 %v990_v43 }
  0xee   : > { %v1334_v38 = vpop.eup %1333  ;;  %1353 = vtanh.f32 %v991_v49  ;;  %1076 = vst [vmem:[%s1956_s28 + $0x100] sm:$0xff] %v1332_v59 }
  0xef   : > { %v1336_v13 = vpop.eup %1335  ;;  %1355 = vtanh.f32 %v992_v51  ;;  %1077 = vst [vmem:[%s1956_s28 + $0x108] sm:$0xff] %v1334_v38 }
  0xf0   : > { %v1338_v36 = vpop.eup %1337  ;;  %1357 = vtanh.f32 %v993_v56  ;;  %1078 = vst [vmem:[%s1956_s28 + $0x110] sm:$0xff] %v1336_v13 }
  0xf1   : > { %v1340_v55 = vpop.eup %1339  ;;  %1359 = vtanh.f32 %v994_v27  ;;  %1079 = vst [vmem:[%s1956_s28 + $0x118] sm:$0xff] %v1338_v36 }
  0xf2   : > { %v1342_v47 = vpop.eup %1341  ;;  %1361 = vtanh.f32 %v995_v57  ;;  %1080 = vst [vmem:[%s1956_s28 + $0x120] sm:$0xff] %v1340_v55 }
  0xf3   : > { %v1344_v30 = vpop.eup %1343  ;;  %1081 = vst [vmem:[%s1956_s28 + $0x128] sm:$0xff] %v1342_v47 }
  0xf4   : > { %v1346_v52 = vpop.eup %1345  ;;  %1082 = vst [vmem:[%s1956_s28 + $0x130] sm:$0xff] %v1344_v30 }
  0xf5   : > { %v1348_v4 = vpop.eup %1347  ;;  %1083 = vst [vmem:[%s1956_s28 + $0x138] sm:$0xff] %v1346_v52 }
  0xf6   : > { %v1350_v32 = vpop.eup %1349  ;;  %1084 = vst [vmem:[%s1956_s28 + $0x140] sm:$0xff] %v1348_v4 }
  0xf7   : > { %v1352_v10 = vpop.eup %1351  ;;  %1085 = vst [vmem:[%s1956_s28 + $0x148] sm:$0xff] %v1350_v32 }
  0xf8   : > { %v1354_v29 = vpop.eup %1353  ;;  %1086 = vst [vmem:[%s1956_s28 + $0x150] sm:$0xff] %v1352_v10 }
  0xf9   : > { %v1356_v40 = vpop.eup %1355  ;;  %1087 = vst [vmem:[%s1956_s28 + $0x158] sm:$0xff] %v1354_v29 }
  0xfa   : > { %v1358_v2 = vpop.eup %1357  ;;  %1088 = vst [vmem:[%s1956_s28 + $0x160] sm:$0xff] %v1356_v40 }
  0xfb   : > { %v1360_v60 = vpop.eup %1359  ;;  %1089 = vst [vmem:[%s1956_s28 + $0x168] sm:$0xff] %v1358_v2 }
  0xfc   : > { %v1362_v46 = vpop.eup %1361  ;;  %1090 = vst [vmem:[%s1956_s28 + $0x170] sm:$0xff] %v1360_v60 }
  0xfd   : > { %1091 = vst [vmem:[%s1956_s28 + $0x178] sm:$0xff] %v1362_v46 }
  0xfe   : > { %1376 = shalt.err (!%p1373_p5)
}
  0xff   : > { %s1377_s11 = scalar_lea.hbm %s2189_s6, 6144  ;;  %s1381_s21 = scalar_lea.hbm %s2248_s3, 12288 }
 0x100   : > { %p1378_p6 = scmp.ne.s32.totalorder %s2189_s6, %s1377_s11  ;;  %p1382_p10 = scmp.lt.u32.totalorder %s2189_s6, %s2248_s3 }
 0x101   : > { %p1383_p11 = scmp.lt.u32.totalorder %s1381_s21, %s1377_s11  ;;  %p1385_p13 = scmp.lt.u32.totalorder %s1377_s11, %s2189_s6 }
 0x102   : > { %p1379_p7 = pnand %p1378_p6, %p1510_p4 }
 0x103   : > { %p1384_p12 = por %p1383_p11, %p1382_p10 }
 0x104   : > { %p1380_p9 = pneg %p1379_p7 }
 0x105   : > { %p1386_p0 = por %p1385_p13, %p1384_p12 }
 0x107   : > { %p1387_p1 = pnand %p1386_p0, %p1380_p9 }
 0x109   : > { %1390 = shalt.err (!%p1387_p1)
}
 0x10a   : > { %s1447_s27 = smov 2048   ;;  %s1448_s28 = smov 4096  }
 0x10b   : > { %s1449_s29 = smov 128  }
 0x10c   : > { %1200 = dma.vmem_to_hbm [thread:$0]  (%p1510_p4), %s2192_s30, 6144, %s2189_s6, %s2199_s15, %s1447_s27, %s1448_s28, %s1449_s29  }
 0x10d PF: > { %p1206_p2 = scmp.ge.s32.totalorder %s1441_s17, 2  ;;  %s1123_s4 = sand.u32 1, %s1421_s12  }
 0x10e   : > { %s1124_s5 = scalar_lea.sflag [#allocation3], %s1123_s4 }
 0x10f   : > { %p1203_p3 = pnand %p1206_p2, %p1517_p8 }
 0x111   : > { %1416 = dma.done.wait (!%p1203_p3), %s1124_s5, 6144  }
 0x112   : > { %1418 = vsyncadd (!%p1203_p3), %s1124_s5, 4294961152  ;;  %s16_s17 = sadd.s32 1, %s1441_s17   ;;  %s2438_s12 = smov %s1425_s13 }
 0x113   : > { %p13_p5 = scmp.ge.s32.totalorder %s16_s17, 4   ;;  %s2439_s13 = smov %s1429_s14 }
 0x114   : > { %s2440_s14 = smov %s1523_s25  ;;  %s2441_s15 = smov %s1437_s16 }
 0x115   : > { %s2442_s16 = smov %s2444_s20  ;;  %15 = sbr.rel (!%p13_p5) target bundleno = 4 (0x4), region = 67 }
 0x11c   :  { %1129 = vsyncpa [#allocation3], 1 }
 0x11d   :  { %1131 = vsyncpa [#allocation3 + $0x1], 1 }

</bundles_post_ra>
